<compile_context>
chip_gen: v7x
topology: tpu7x:2x2x1
jax: 0.10.0
libtpu: 0.0.40
codegen_flags: <defaults>
</compile_context>

<pallas_src>
import jax
import jax.numpy as jnp
from jax.experimental import pallas as pl
from jax.experimental.pallas import tpu as pltpu


def attn_pool_kernel(r_ref, w_ref, u_ref, o_ref):
    """Single grid-less invocation, all batches resident, fully batched math.

    r_ref: (B, D, S) f32 VMEM   -- native PyTorch layout, no transpose anywhere
    w_ref: (B, 1)    f32 VMEM   -- per-batch relation scalar (rel_emb == 1)
    u_ref: (D, 1)    f32 VMEM   -- shared attention vector in its native shape
    o_ref: (B, D)    f32 VMEM   -- pooled output (trailing 1-dim added in wrapper)
    """
    r = r_ref[...]                                             # [B, D, S]
    u = u_ref[...]                                             # [D, 1]
    w = w_ref[...]                                             # [B, 1]

    # G[b, s] = w[b] * sum_d R[b, d, s] * U[d]
    # (VPU multiply + sublane reduce; MXU unused on purpose -- it would be <7%
    #  occupied at D=32, S=8 and only add MRF/MRB latency.)
    g = jnp.sum(r * u[None, :, :], axis=1) * w                 # [B, S]

    # Numerically-stable softmax numerator over the sequence axis.
    e = jnp.exp(g - jnp.max(g, axis=1, keepdims=True))         # [B, S]

    # Max-pool over the sequence first, normalize once after:
    #   max_s(r * e / sum(e)) == max_s(r * e) / sum(e)   since 1/sum(e) > 0.
    # (Do NOT reorder if a signed scale is ever introduced here.)
    m = jnp.max(r * e[:, None, :], axis=2)                     # [B, D]
    denom = jnp.sum(e, axis=1, keepdims=True)                  # [B, 1]
    o_ref[...] = m / denom                                     # single block store


def attn_pool(r_star, w_l, u):
    """R_star: [B, D, S], W_L: [B, 1, 1], U: [D, 1]  ->  [B, D, 1]."""
    B, D, S = r_star.shape
    # TODO(synk): assumes rel_emb == 1 (W_L is [B, 1, 1]); with rel_emb > 1 the
    # G = RU @ W_L step is a real contraction, not a per-batch scalar scale.
    assert w_l.shape == (B, 1, 1), w_l.shape
    assert u.shape == (D, 1), u.shape

    w_vec = w_l.reshape(B, 1)                 # free bitcast-reshape, no data movement

    cost = pl.CostEstimate(
        flops=4 * B * D * S,                  # mul+sum for RU, mul+max for the pool
        transcendentals=B * S,                # exp of G
        bytes_accessed=(B * D * S + B + D + B * D) * 4,
    )

    out = pl.pallas_call(
        attn_pool_kernel,
        out_shape=jax.ShapeDtypeStruct((B, D), r_star.dtype),
        in_specs=[
            pl.BlockSpec(memory_space=pltpu.MemorySpace.VMEM),   # R_star (one DMA, native layout)
            pl.BlockSpec(memory_space=pltpu.MemorySpace.VMEM),   # W_L per-batch scalars
            pl.BlockSpec(memory_space=pltpu.MemorySpace.VMEM),   # U
        ],
        out_specs=pl.BlockSpec(memory_space=pltpu.MemorySpace.VMEM),
        cost_estimate=cost,
    )(r_star, w_vec, u)
    return out[:, :, None]                    # [B, D, 1] to match MaxPool1d output

    # NOTE: if this op is invoked many times per step, stack the calls and issue one
    # pallas_call over a larger leading batch -- the fixed launch + DMA setup cost
    # dominates wall clock at this problem size.


def attn_pool_ref(r_star, w_l, u):
    # Pure-JAX reference mirroring the PyTorch forward.
    ru = jnp.einsum("bds,do->bso", r_star, u)            # [B, S, 1]
    g = jnp.einsum("bso,bor->bsr", ru, w_l)              # [B, S, 1]
    ap = jax.nn.softmax(g, axis=1)                       # softmax over S
    ra = r_star * jnp.transpose(ap, (0, 2, 1))           # [B, D, S]
    return jnp.max(ra, axis=2, keepdims=True)            # [B, D, 1]


if __name__ == "__main__":
    # config.hidden_size = 32 (= d_c), config.max_sen_len = 8 (= s_l), rel_emb = 1
    B, D, S = 2, 32, 8

    key = jax.random.PRNGKey(0)
    k_r, k_w, k_u = jax.random.split(key, 3)
    r_star = jax.random.normal(k_r, (B, D, S), dtype=jnp.float32)
    w_l = jax.random.normal(k_w, (B, 1, 1), dtype=jnp.float32)
    u = jax.random.normal(k_u, (D, 1), dtype=jnp.float32)   # nn.Parameter(torch.randn(D, 1))

    out = jax.block_until_ready(attn_pool(r_star, w_l, u))
    ref = attn_pool_ref(r_star, w_l, u)

    assert out.shape == (B, D, 1), out.shape
    # Exact divide in-kernel (no approx reciprocal) -> tight parity with the
    # exact-softmax reference.
    assert jnp.allclose(out, ref, atol=1e-5, rtol=1e-5), \
        f"max err {jnp.max(jnp.abs(out - ref))}"
    print("KERNEL_OK")
</pallas_src>

<mosaic_0001>
module attributes {stable_mosaic.version = 11 : i64} {
  func.func @attn_pool_kernel(%arg0: memref<2x32x8xf32, #tpu.memory_space<vmem>>, %arg1: memref<2x1xf32, #tpu.memory_space<vmem>>, %arg2: memref<32x1xf32, #tpu.memory_space<vmem>>, %arg3: memref<2x32xf32, #tpu.memory_space<vmem>>) attributes {dimension_semantics = [], scalar_prefetch = 0 : i64, scratch_operands = 0 : i64, tpu.core_type = #tpu.core_type<tc>} {
    %c0 = arith.constant 0 : index
    %c0_0 = arith.constant 0 : index
    %c0_1 = arith.constant 0 : index
    %0 = vector.load %arg0[%c0, %c0_0, %c0_1] : memref<2x32x8xf32, #tpu.memory_space<vmem>>, vector<2x32x8xf32>
    %c0_2 = arith.constant 0 : index
    %c0_3 = arith.constant 0 : index
    %1 = vector.load %arg2[%c0_2, %c0_3] : memref<32x1xf32, #tpu.memory_space<vmem>>, vector<32x1xf32>
    %c0_4 = arith.constant 0 : index
    %c0_5 = arith.constant 0 : index
    %2 = vector.load %arg1[%c0_4, %c0_5] : memref<2x1xf32, #tpu.memory_space<vmem>>, vector<2x1xf32>
    %3 = vector.shape_cast %1 : vector<32x1xf32> to vector<1x32x1xf32>
    %4 = vector.broadcast %3 : vector<1x32x1xf32> to vector<2x32x8xf32>
    %5 = arith.mulf %0, %4 : vector<2x32x8xf32>
    %cst = arith.constant dense<0.000000e+00> : vector<2x8xf32>
    %6 = vector.multi_reduction <add>, %5, %cst [1] : vector<2x32x8xf32> to vector<2x8xf32>
    %7 = vector.broadcast %2 : vector<2x1xf32> to vector<2x8xf32>
    %8 = arith.mulf %6, %7 : vector<2x8xf32>
    %cst_6 = arith.constant dense<0xFF800000> : vector<2xf32>
    %9 = vector.multi_reduction <maximumf>, %8, %cst_6 [1] : vector<2x8xf32> to vector<2xf32>
    %10 = vector.shape_cast %9 : vector<2xf32> to vector<2x1xf32>
    %11 = vector.broadcast %10 : vector<2x1xf32> to vector<2x8xf32>
    %12 = arith.subf %8, %11 : vector<2x8xf32>
    %13 = math.exp %12 : vector<2x8xf32>
    %14 = vector.shape_cast %13 : vector<2x8xf32> to vector<2x1x8xf32>
    %15 = vector.broadcast %14 : vector<2x1x8xf32> to vector<2x32x8xf32>
    %16 = arith.mulf %0, %15 : vector<2x32x8xf32>
    %cst_7 = arith.constant dense<0xFF800000> : vector<2x32xf32>
    %17 = vector.multi_reduction <maximumf>, %16, %cst_7 [2] : vector<2x32x8xf32> to vector<2x32xf32>
    %cst_8 = arith.constant dense<0.000000e+00> : vector<2xf32>
    %18 = vector.multi_reduction <add>, %13, %cst_8 [1] : vector<2x8xf32> to vector<2xf32>
    %19 = vector.shape_cast %18 : vector<2xf32> to vector<2x1xf32>
    %20 = vector.broadcast %19 : vector<2x1xf32> to vector<2x32xf32>
    %21 = arith.divf %17, %20 : vector<2x32xf32>
    %c0_9 = arith.constant 0 : index
    %c0_10 = arith.constant 0 : index
    %22 = vector.load %arg3[%c0_9, %c0_10] : memref<2x32xf32, #tpu.memory_space<vmem>>, vector<2x32xf32>
    tpu.vector_store %arg3[%c0_9, %c0_10], %21 {strides = array<i32>} : memref<2x32xf32, #tpu.memory_space<vmem>>, vector<2x32xf32>,
    return
  }
}

</mosaic_0001>

<bundles_post_ra>
// kernel: tpu_custom_call.1
= control target key start
LH: loop header
LB: loop body
LE: loop exit
PB: predicated region body
PF: predicated region fallthrough
CT: control target
= control target key end

     0   :  { %v313_v2 = vmov 0   ;;  %s449_s0 = inlined_call_operand.vmem [shape: f32[2,32,8], index: 0, kind: input, shape index: {}]   ;;  %s450_s1 = inlined_call_operand.vmem [shape: f32[2,1], index: 1, kind: input, shape index: {}]   ;;  %s451_s2 = inlined_call_operand.vmem [shape: f32[32,1], index: 2, kind: input, shape index: {}]   ;;  %s452_s3 = inlined_call_operand.hbm [shape: f32[2,32], index: 3, kind: output, shape index: {}]  }
   0x1   :  { %v25_v0 = vld [vmem:[%s451_s2 + $0x10] sm:$0xff]  ;;  %v23_v1 = vld [vmem:[%s451_s2] sm:$0xff]  ;;  %280 = vset.pattern.permute.xlu1 %v313_v2  ;;  %279 = vset.pattern.permute.xlu0 %v313_v2  ;;  %v26_v3 = vld [vmem:[%s451_s2 + $0x18] sm:$0xff] }
   0x2   :  { %40 = vperm.xlu1 %280, %v25_v0   ;;  %30 = vperm.xlu0 %279, %v23_v1   ;;  %v24_v4 = vld [vmem:[%s451_s2 + $0x8] sm:$0xff] }
   0x3   :  { %8 = vsyncpa [#allocation3], 0  ;;  %v27_v5 = vld [vmem:[%s450_s1] sm:$0x3]  ;;  %v363_v10 = vld [vmem:[%s449_s0 + $0x10] sm:$0xff]  ;;  %vm56_vm0 = vcmask 64512   ;;  %v112_v0 = vlaneseq }
   0x4   :  { %v353_v6 = vld [vmem:[%s449_s0] sm:$0xff]  ;;  %v368_v11 = vld [vmem:[%s449_s0 + $0x30] sm:$0xff]  ;;  %v375_v14 = vld [vmem:[%s449_s0 + $0x8] sm:$0xff]  ;;  %vm95_vm1 = vcmask 1041409   ;;  %vm98_vm2 = vcmask 58368   ;;  %vm224_vm3 = vcmask 130112  }
   0x5   :  { %v358_v7 = vld [vmem:[%s449_s0 + $0x20] sm:$0xff]  ;;  %v380_v15 = vld [vmem:[%s449_s0 + $0x28] sm:$0xff]  ;;  %v385_v17 = vld [vmem:[%s449_s0 + $0x18] sm:$0xff]  ;;  %v409_v2 = vshrl.u32 %v112_v0, 7  ;;  %vm231_vm4 = vcmask 195712   ;;  %vm238_vm5 = vcmask 261312  }
   0x6   :  { %45 = vperm.xlu1 %280, %v26_v3   ;;  %35 = vperm.xlu0 %279, %v24_v4   ;;  %v390_v18 = vld [vmem:[%s449_s0 + $0x38] sm:$0xff]  ;;  %s314_s0 = smov [#allocation2]   ;;  %vm261_vm6 = vcmask 254976  }
   0x7   :  { %v114_v3 = vsub.s32 0, %v409_v2  ;;  %s269_s9 = sshll.u32 %s314_s0, 4  ;;  %s270_s9 = int_to_ptr.vmem [resolvable:$true] %s269_s9 }
   0x8   :  { %s289_s10 = scalar_lea.vmem %s270_s9, 32  ;;  %p294_p1 = scmp.lt.s32.totalorder %s270_s9, %s270_s9 }
   0x9   :  { %p290_p0 = scmp.ne.s32.totalorder %s270_s9, %s289_s10  ;;  %p295_p2 = scmp.lt.s32.totalorder %s289_s10, %s289_s10 }
   0xa   :  { %85 = vperm.xlu0 %279, %v27_v5  }
   0xb   :  { %p296_p3 = por %p295_p2, %p294_p1 }
   0xd   :  { %p297_p4 = pnand %p296_p3, %p290_p0 }
  0x81   :  { %v41_v8 = vpop.permute.xlu1 %40  ;;  %v31_v9 = vpop.permute.xlu0 %30 }
  0x82   :  { %v48_v12 = vmul.f32 %v31_v9, %v353_v6  ;;  %v52_v13 = vmul.f32 %v31_v9, %v358_v7  ;;  %v50_v20 = vmul.f32 %v41_v8, %v363_v10  ;;  %v54_v21 = vmul.f32 %v41_v8, %v368_v11 }
  0x84   :  { %v57_v24 = vsel %vm56_vm0, %v48_v12, 0.0  ;;  %v70_v25 = vsel %vm56_vm0, %v52_v13, 0.0  ;;  %v60_v32 = vsel %vm56_vm0, %v50_v20, 0.0  ;;  %v73_v33 = vsel %vm56_vm0, %v54_v21, 0.0 }
  0x85   :  { %v46_v16 = vpop.permute.xlu1 %45  ;;  %v36_v19 = vpop.permute.xlu0 %35 }
  0x86   :  { %v49_v22 = vmul.f32 %v36_v19, %v375_v14  ;;  %v53_v23 = vmul.f32 %v36_v19, %v380_v15  ;;  %v51_v26 = vmul.f32 %v46_v16, %v385_v17  ;;  %v55_v27 = vmul.f32 %v46_v16, %v390_v18 }
  0x88   :  { %v58_v28 = vsel %vm56_vm0, %v49_v22, 0.0  ;;  %v71_v29 = vsel %vm56_vm0, %v53_v23, 0.0  ;;  %v62_v36 = vsel %vm56_vm0, %v51_v26, 0.0  ;;  %v75_v37 = vsel %vm56_vm0, %v55_v27, 0.0 }
  0x89   :  { %v59_v30 = vadd.f32 %v58_v28, %v57_v24  ;;  %v72_v31 = vadd.f32 %v71_v29, %v70_v25  ;;  %v86_v48 = vpop.permute.xlu0 %85 }
  0x8a   :  { %v87_v53 = vrot.slane %v86_v48, 1 }
  0x8b   :  { %v61_v34 = vadd.f32 %v60_v32, %v59_v30  ;;  %v74_v35 = vadd.f32 %v73_v33, %v72_v31  ;;  %v167_v30 = vsub.s32 1, %v409_v2 }
  0x8d   :  { %v63_v38 = vadd.f32 %v62_v36, %v61_v34  ;;  %v76_v39 = vadd.f32 %v75_v37, %v74_v35 }
  0x8f   :  { %v77_v40 = vrot.slane %v76_v39, 4  ;;  %v64_v41 = vrot.slane %v63_v38, 4 }
  0x91   :  { %v65_v42 = vadd.f32 %v64_v41, %v63_v38  ;;  %v78_v43 = vadd.f32 %v77_v40, %v76_v39 }
  0x93   :  { %v66_v44 = vrot.slane %v65_v42, 2  ;;  %v79_v45 = vrot.slane %v78_v43, 2 }
  0x95   :  { %v67_v46 = vadd.f32 %v66_v44, %v65_v42  ;;  %v80_v47 = vadd.f32 %v79_v45, %v78_v43 }
  0x97   :  { %v68_v49 = vrot.slane %v67_v46, 1  ;;  %v81_v50 = vrot.slane %v80_v47, 1 }
  0x99   :  { %v69_v51 = vadd.f32 %v68_v49, %v67_v46  ;;  %v82_v52 = vadd.f32 %v81_v50, %v80_v47  ;;  %v214_v49 = vand.u32 127, %v112_v0 }
  0x9b   :  { %v91_v54 = vmul.f32 %v87_v53, %v82_v52  ;;  %v90_v55 = vmul.f32 %v86_v48, %v69_v51  ;;  %v219_v52 = vadd.s32 4294967288, %v214_v49  ;;  %v226_v53 = vadd.s32 4294967280, %v214_v49 }
  0x9d   :  { %v94_v56 = vrot.slane %v91_v54, 7 }
  0x9f   :  { %v96_v57 = vsel %vm95_vm1, %v94_v56, %v90_v55  ;;  %v233_v56 = vadd.s32 4294967272, %v214_v49 }
  0xa0   :  { %v99_v58 = vsel %vm98_vm2, %v96_v57, -inf  ;;  %v222_v57 = vsub.s32 %v219_v52, %v409_v2 }
  0xa1   :  { %100 = vmax.xlane.f32.xlu1 %v99_v58  ;;  %v217_v58 = vsub.s32 %v214_v49, %v409_v2 }
 0x12e   :  { %v101_v59 = vpop.xlane.xlu1 %100 }
 0x12f   :  { %v103_v60 = vrot.slane %v101_v59, 1  ;;  %v106_v61 = vsub.f32 %v90_v55, %v101_v59  ;;  %v229_v59 = vsub.s32 %v226_v53, %v409_v2 }
 0x131   :  { %v107_v62 = vsub.f32 %v91_v54, %v103_v60  ;;  %v108_v63 = vmul.f32 1.442695, %v106_v61 }
 0x133   :  { %281 = vpow2.f32 %v108_v63  ;;  %v110_v1 = vmul.f32 1.442695, %v107_v62  ;;  %v236_v62 = vsub.s32 %v233_v56, %v409_v2 }
 0x135   :  { %283 = vpow2.f32 %v110_v1 }
 0x13d   :  { %v282_v4 = vpop.eup %281 }
 0x13e   :  { %v115_v5 = vrot.slane %v282_v4, %v114_v3 }
 0x13f   :  { %v284_v8 = vpop.eup %283 }
 0x140   :  { %v121_v9 = vmul.f32 %v115_v5, %v375_v14  ;;  %v154_v12 = vrot.slane %v284_v8, 7  ;;  %v119_v13 = vrot.slane %v284_v8, %v114_v3  ;;  %v120_v22 = vmul.f32 %v115_v5, %v353_v6 }
 0x141   :  { %v122_v25 = vmul.f32 %v115_v5, %v363_v10  ;;  %v123_v29 = vmul.f32 %v115_v5, %v385_v17 }
 0x142   :  { %v131_v16 = vsel %vm56_vm0, %v121_v9, -inf  ;;  %v155_v19 = vsel %vm95_vm1, %v154_v12, %v282_v4  ;;  %v125_v20 = vmul.f32 %v119_v13, %v380_v15  ;;  %v126_v24 = vmul.f32 %v119_v13, %v368_v11 }
 0x143   :  { %132 = vmax.xlane.f32.xlu1 %v131_v16  ;;  %v157_v21 = vsel %vm98_vm2, %v155_v19, 0.0  ;;  %v128_v14 = vsel %vm56_vm0, %v120_v22, -inf  ;;  %v127_v15 = vmul.f32 %v119_v13, %v390_v18  ;;  %v134_v27 = vsel %vm56_vm0, %v122_v25, -inf }
 0x144   :  { %158 = vadd.xlane.f32.xlu0 %v157_v21  ;;  %v143_v23 = vsel %vm56_vm0, %v125_v20, -inf  ;;  %v146_v26 = vsel %vm56_vm0, %v126_v24, -inf  ;;  %v124_v6 = vmul.f32 %v119_v13, %v358_v7  ;;  %v137_v10 = vsel %vm56_vm0, %v123_v29, -inf }
 0x145   :  { %v149_v28 = vsel %vm56_vm0, %v127_v15, -inf }
 0x146   :  { %v140_v11 = vsel %vm56_vm0, %v124_v6, -inf }
 0x147   :  { %144 = vmax.xlane.f32.xlu1 %v143_v23 }
 0x148   :  { %129 = vmax.xlane.f32.xlu0 %v128_v14 }
 0x14b   :  { %147 = vmax.xlane.f32.xlu1 %v146_v26 }
 0x14c   :  { %135 = vmax.xlane.f32.xlu0 %v134_v27 }
 0x14f   :  { %150 = vmax.xlane.f32.xlu1 %v149_v28 }
 0x150   :  { %141 = vmax.xlane.f32.xlu0 %v140_v11 }
 0x154   :  { %138 = vmax.xlane.f32.xlu0 %v137_v10 }
 0x1d0   :  { %v133_v7 = vpop.xlane.xlu1 %132 }
 0x1d1   :  { %v159_v18 = vpop.xlane.xlu0 %158 }
 0x1d2   :  { %v164_v31 = vrot.slane %v159_v18, %v114_v3  ;;  %v168_v32 = vrot.slane %v159_v18, %v167_v30 }
 0x1d4   :  { %285 = vrcp.f32 %v164_v31  ;;  %v145_v36 = vpop.xlane.xlu1 %144 }
 0x1d5   :  { %v130_v33 = vpop.xlane.xlu0 %129  ;;  %287 = vrcp.f32 %v168_v32 }
 0x1d8   :  { %v148_v42 = vpop.xlane.xlu1 %147 }
 0x1d9   :  { %v136_v34 = vpop.xlane.xlu0 %135 }
 0x1dc   :  { %v151_v46 = vpop.xlane.xlu1 %150 }
 0x1dd   :  { %v142_v17 = vpop.xlane.xlu0 %141 }
 0x1de   :  { %v286_v35 = vpop.eup %285 }
 0x1df   :  { %v172_v37 = vmul.f32 %v286_v35, %v130_v33  ;;  %v173_v38 = vmul.f32 %v286_v35, %v133_v7  ;;  %v288_v39 = vpop.eup %287  ;;  %v174_v44 = vmul.f32 %v286_v35, %v136_v34 }
 0x1e0   :  { %v178_v40 = vmul.f32 %v288_v39, %v145_v36  ;;  %v177_v41 = vmul.f32 %v288_v39, %v142_v17  ;;  %v179_v43 = vmul.f32 %v288_v39, %v148_v42  ;;  %v180_v47 = vmul.f32 %v288_v39, %v151_v46 }
 0x1e1   :  { %193 = vperm.xlu1 %280, %v173_v38   ;;  %190 = vperm.xlu0 %279, %v172_v37   ;;  %v139_v45 = vpop.xlane.xlu0 %138 }
 0x1e2   :  { %v175_v48 = vmul.f32 %v286_v35, %v139_v45 }
 0x1e5   :  { %205 = vperm.xlu0 %279, %v178_v40   ;;  %202 = vperm.xlu1 %280, %v177_v41  }
 0x1e9   :  { %208 = vperm.xlu0 %279, %v179_v43   ;;  %196 = vperm.xlu1 %280, %v174_v44  }
 0x1ed   :  { %211 = vperm.xlu0 %279, %v180_v47   ;;  %199 = vperm.xlu1 %280, %v175_v48  }
 0x260   :  { %v194_v50 = vpop.permute.xlu1 %193  ;;  %v191_v51 = vpop.permute.xlu0 %190 }
 0x261   :  { %v223_v63 = vrot.slane %v194_v50, %v222_v57  ;;  %v218_v1 = vrot.slane %v191_v51, %v217_v58 }
 0x263   :  { %v225_v12 = vsel %vm224_vm3, %v223_v63, %v218_v1 }
 0x264   :  { %v203_v54 = vpop.permute.xlu1 %202  ;;  %v206_v55 = vpop.permute.xlu0 %205 }
 0x265   :  { %v243_v0 = vrot.slane %v203_v54, %v217_v58  ;;  %v247_v3 = vrot.slane %v206_v55, %v222_v57 }
 0x267   :  { %v248_v13 = vsel %vm224_vm3, %v247_v3, %v243_v0 }
 0x268   :  { %v197_v60 = vpop.permute.xlu1 %196  ;;  %v209_v61 = vpop.permute.xlu0 %208 }
 0x269   :  { %v230_v4 = vrot.slane %v197_v60, %v229_v59  ;;  %v252_v5 = vrot.slane %v209_v61, %v229_v59 }
 0x26b   :  { %v232_v20 = vsel %vm231_vm4, %v230_v4, %v225_v12  ;;  %v253_v21 = vsel %vm231_vm4, %v252_v5, %v248_v13 }
 0x26c   :  { %v200_v8 = vpop.permute.xlu1 %199  ;;  %v212_v9 = vpop.permute.xlu0 %211 }
 0x26d   :  { %v237_v16 = vrot.slane %v200_v8, %v236_v62  ;;  %v257_v19 = vrot.slane %v212_v9, %v236_v62 }
 0x26f   :  { %v239_v2 = vsel %vm238_vm5, %v237_v16, %v232_v20  ;;  %v258_v22 = vsel %vm238_vm5, %v257_v19, %v253_v21 }
 0x270   :  { %v259_v23 = vsel %vm95_vm1, %v258_v22, %v239_v2 }
 0x271   :  { %262 = vst.msk [vmem:[#allocation2] sm:$0x3] %vm261_vm6, %v259_v23 }
 0x272   :  { %300 = shalt.err (!%p297_p4)
}
 0x273   :  { %s301_s13 = scalar_lea.hbm %s452_s3, 32 }
 0x274   :  { %p302_p5 = scmp.ne.s32.totalorder %s452_s3, %s301_s13  ;;  %p305_p6 = scmp.lt.u32.totalorder %s301_s13, %s452_s3 }
 0x276   :  { %p307_p7 = pnand %p305_p6, %p302_p5 }
 0x278   :  { %310 = shalt.err (!%p307_p7)
}
 0x279   :  { %272 = dma.vmem_to_hbm [thread:$0]  %s270_s9, 32, %s452_s3, [#allocation3]  }
 0x27a   :  { %311 = dma.done.wait [#allocation3], 32  }
 0x27b   :  { %312 = vsyncadd [#allocation3], 4294967264 }
 0x27c   :  { %276 = vsyncpa [#allocation3], 1 }

</bundles_post_ra>
